<compile_context>
chip_gen: v5e
topology: v5e:2x2
jax: 0.10.0
libtpu: 0.0.40
codegen_flags: <defaults>
</compile_context>

<pallas_src>
import jax
import jax.numpy as jnp
from jax import lax
from jax.experimental import pallas as pl
from jax.experimental.pallas import tpu as pltpu

LANES = 128
SUBLANE_TILE = 8 * LANES  # 1024: output-row blocks must be sublane (8) aligned


def _round_up(a, b):
    return (a + b - 1) // b * b


def dk_mlp_kernel(phi_ref, w1_ref, b1_ref, w2_ref, b2_ref, w3_ref, b3_ref, out_ref):
    # ---- layer 1: Linear(input_dim -> H) + ReLU, f32 (K is tiny; keep phi precision).
    h = jnp.dot(phi_ref[...], w1_ref[...], preferred_element_type=jnp.float32)
    h = jnp.maximum(h + b1_ref[...], 0.0)

    # ---- layer 2: Linear(H -> H) + ReLU; bf16 operands on the MXU, f32 accumulate.
    h = jnp.dot(h.astype(w2_ref.dtype), w2_ref[...], preferred_element_type=jnp.float32)
    h = jnp.maximum(h + b2_ref[...], 0.0)                        # (tile_n, hp) f32

    # ---- head: Linear(H -> 1) on the VPU (multiply + lane reduce), no MXU pushes.
    tile_r, lanes = out_ref.shape                                # (tile_n // 128, 128)
    hp = h.shape[-1]
    h3 = h.reshape(tile_r, lanes, hp)                            # splits sublane dim only
    col = jnp.sum(h3 * w3_ref[...], axis=-1, keepdims=True)      # (tile_r, 128, 1)

    # Sublane -> lane relayout so the stored block is lane-dense (unmasked vst,
    # contiguous writeback DMA).  Use jnp.where (not *) so NaN/Inf in out-of-range
    # garbage rows cannot leak into valid rows of the same 128-row group.
    eye = (lax.broadcasted_iota(jnp.int32, (lanes, lanes), 0)
           == lax.broadcasted_iota(jnp.int32, (lanes, lanes), 1))
    outv = jnp.sum(jnp.where(eye, col, 0.0), axis=-2)            # (tile_r, 128)
    out_ref[...] = (outv + b3_ref[...]).astype(out_ref.dtype)


def deep_kriging_forward(phi, padded_params, *, max_tile_rows=2048):
    """phi: [N, input_dim] f32 (passed to the kernel unpadded / uncast).
    padded_params from pad_params_for_kernel.  Returns [N, 1] f32."""
    n, din = phi.shape
    w1, b1, w2, b2, w3, b3 = padded_params
    hp = w1.shape[1]

    n_pad = _round_up(n, LANES)                       # output rows, multiple of 128
    if n_pad <= SUBLANE_TILE:
        # Tiny batch: a single block.  Row-pad phi (cheap here) so block <= array.
        tile_n = n_pad
        if n != n_pad:
            phi = jnp.pad(phi, ((0, n_pad - n), (0, 0)))
    else:
        # Multiple of 1024 (=8*128) keeps the lane-dense output block sublane aligned;
        # cap so the grid has >= 2 steps (v7x megacore gets both TensorCores).
        tile_n = min(_round_up(max_tile_rows, SUBLANE_TILE),
                     _round_up(pl.cdiv(n_pad, 2), SUBLANE_TILE))
    tile_r = tile_n // LANES
    grid = (pl.cdiv(n_pad, tile_n),)

    const = lambda i: (0, 0)   # weights/biases: same block every step -> VMEM resident
    out2d = pl.pallas_call(
        dk_mlp_kernel,
        out_shape=jax.ShapeDtypeStruct((n_pad // LANES, LANES), jnp.float32),
        grid=grid,
        in_specs=[
            pl.BlockSpec((tile_n, din), lambda i: (i, 0)),   # phi (streamed, f32)
            pl.BlockSpec((din, hp), const),                  # W1 (f32)
            pl.BlockSpec((1, hp), const),                    # b1
            pl.BlockSpec((hp, hp), const),                   # W2 (bf16)
            pl.BlockSpec((1, hp), const),                    # b2
            pl.BlockSpec((1, hp), const),                    # W3 as a row (f32)
            pl.BlockSpec((1, 1), const),                     # b3
        ],
        out_specs=pl.BlockSpec((tile_r, LANES), lambda i: (i, 0)),
        compiler_params=pltpu.CompilerParams(
            dimension_semantics=("parallel",),      # batch tiles across TCs (v7x)
            vmem_limit_bytes=32 * 1024 * 1024,      # safe on v5e/v6e/v7x
        ),
    )(phi, w1, b1, w2, b2, w3, b3)

    # Lane-dense (n_pad//128, 128) -> (n, 1); free metadata reshapes in XLA.
    return out2d.reshape(-1)[:n].reshape(n, 1)


def init_params(key, input_dim, hidden):
    """Synthetic parameters matching DeepKrigingMLP(input_dim, 2, hidden):
       Linear(input_dim, H) -> ReLU -> Linear(H, H) -> ReLU -> Linear(H, 1).
       Weights stored [in, out] (transpose of torch's [out, in])."""
    k = jax.random.split(key, 6)
    w1 = jax.random.normal(k[0], (input_dim, hidden), jnp.float32) / jnp.sqrt(input_dim)
    b1 = jax.random.normal(k[1], (hidden,), jnp.float32) * 0.1
    w2 = jax.random.normal(k[2], (hidden, hidden), jnp.float32) / jnp.sqrt(hidden)
    b2 = jax.random.normal(k[3], (hidden,), jnp.float32) * 0.1
    w3 = jax.random.normal(k[4], (hidden, 1), jnp.float32) / jnp.sqrt(hidden)
    b3 = jax.random.normal(k[5], (1,), jnp.float32) * 0.1
    return (w1, b1, w2, b2, w3, b3)


def pad_params_for_kernel(params):
    """Zero-pad the hidden dim to 128 lanes.  Only W2 (the big HxH matmul operand) is
    cast to bf16; everything else stays f32.  Padding leaves the math unchanged:
    padded hidden units are ReLU(0)=0 and have zero outgoing weights."""
    w1, b1, w2, b2, w3, b3 = params
    din, h = w1.shape
    hp = _round_up(max(h, LANES), LANES)

    w1p = jnp.zeros((din, hp), jnp.float32).at[:, :h].set(w1)
    b1p = jnp.zeros((1, hp), jnp.float32).at[:, :h].set(b1)
    w2p = jnp.zeros((hp, hp), jnp.float32).at[:h, :h].set(w2).astype(jnp.bfloat16)
    b2p = jnp.zeros((1, hp), jnp.float32).at[:, :h].set(b2)
    w3p = jnp.zeros((1, hp), jnp.float32).at[0, :h].set(w3[:, 0])   # head as a row
    b3p = b3.reshape(1, 1).astype(jnp.float32)
    return (w1p, b1p, w2p, b2p, w3p, b3p)


def reference_forward(phi, params):
    """Plain-JAX f32 reference of the torch forward."""
    w1, b1, w2, b2, w3, b3 = params
    h = jnp.maximum(phi @ w1 + b1, 0.0)
    h = jnp.maximum(h @ w2 + b2, 0.0)
    return h @ w3 + b3


if __name__ == "__main__":
    # Small shapes consistent with the module: phi basis features -> 2 hidden layers -> 1 output.
    N, INPUT_DIM, HIDDEN = 8, 10, 32

    key = jax.random.PRNGKey(0)
    k_phi, k_params = jax.random.split(key)
    phi = jax.random.normal(k_phi, (N, INPUT_DIM), jnp.float32)

    params = init_params(k_params, INPUT_DIM, HIDDEN)
    padded_params = pad_params_for_kernel(params)

    out = deep_kriging_forward(phi, padded_params)
    out = jax.block_until_ready(out)

    ref = reference_forward(phi, params)
    assert out.shape == (N, 1), out.shape
    # Layer-2 runs with bf16 MXU operands vs. the f32 reference -> loose tolerance.
    assert jnp.allclose(out, ref, atol=5e-2, rtol=5e-2), (out, ref)

    print("KERNEL_OK")
</pallas_src>

<mosaic_0001>
module attributes {stable_mosaic.version = 11 : i64} {
  func.func @dk_mlp_kernel(%arg0: i32, %arg1: memref<128x10xf32, #tpu.memory_space<vmem>>, %arg2: memref<10x128xf32, #tpu.memory_space<vmem>>, %arg3: memref<1x128xf32, #tpu.memory_space<vmem>>, %arg4: memref<128x128xbf16, #tpu.memory_space<vmem>>, %arg5: memref<1x128xf32, #tpu.memory_space<vmem>>, %arg6: memref<1x128xf32, #tpu.memory_space<vmem>>, %arg7: memref<1x1xf32, #tpu.memory_space<vmem>>, %arg8: memref<1x128xf32, #tpu.memory_space<vmem>>) attributes {dimension_semantics = [#tpu.dimension_semantics<parallel>], iteration_bounds = array<i64: 1>, scalar_prefetch = 0 : i64, scratch_operands = 0 : i64, tpu.core_type = #tpu.core_type<tc>, window_params = [{transform_indices = @transform_0, window_bounds = array<i64: 128, 10>}, {pipeline_mode = #tpu.pipeline_mode<synchronous>, transform_indices = @transform_1, window_bounds = array<i64: 10, 128>}, {pipeline_mode = #tpu.pipeline_mode<synchronous>, transform_indices = @transform_2, window_bounds = array<i64: 1, 128>}, {pipeline_mode = #tpu.pipeline_mode<synchronous>, transform_indices = @transform_3, window_bounds = array<i64: 128, 128>}, {pipeline_mode = #tpu.pipeline_mode<synchronous>, transform_indices = @transform_4, window_bounds = array<i64: 1, 128>}, {pipeline_mode = #tpu.pipeline_mode<synchronous>, transform_indices = @transform_5, window_bounds = array<i64: 1, 128>}, {pipeline_mode = #tpu.pipeline_mode<synchronous>, transform_indices = @transform_6, window_bounds = array<i64: 1, 1>}, {transform_indices = @transform_7, window_bounds = array<i64: 1, 128>}]} {
    %c0 = arith.constant 0 : index
    %c0_0 = arith.constant 0 : index
    %0 = vector.load %arg1[%c0, %c0_0] : memref<128x10xf32, #tpu.memory_space<vmem>>, vector<128x10xf32>
    %c0_1 = arith.constant 0 : index
    %c0_2 = arith.constant 0 : index
    %1 = vector.load %arg2[%c0_1, %c0_2] : memref<10x128xf32, #tpu.memory_space<vmem>>, vector<10x128xf32>
    %cst = arith.constant dense<0.000000e+00> : vector<128x128xf32>
    %2 = tpu.matmul %0, %1, %cst {dimension_numbers = #tpu.dot_dimension_numbers<[1], [0], [0], [1], [0, 0, 1, 1], [], []>} : vector<128x10xf32>, vector<10x128xf32>, vector<128x128xf32> -> vector<128x128xf32>
    %c0_3 = arith.constant 0 : index
    %c0_4 = arith.constant 0 : index
    %3 = vector.load %arg3[%c0_3, %c0_4] : memref<1x128xf32, #tpu.memory_space<vmem>>, vector<1x128xf32>
    %4 = vector.broadcast %3 : vector<1x128xf32> to vector<128x128xf32>
    %5 = arith.addf %2, %4 : vector<128x128xf32>
    %cst_5 = arith.constant 0.000000e+00 : f32
    %6 = vector.broadcast %cst_5 : f32 to vector<128x128xf32>
    %7 = arith.maximumf %5, %6 : vector<128x128xf32>
    %8 = arith.truncf %7 : vector<128x128xf32> to vector<128x128xbf16>
    %c0_6 = arith.constant 0 : index
    %c0_7 = arith.constant 0 : index
    %9 = vector.load %arg4[%c0_6, %c0_7] : memref<128x128xbf16, #tpu.memory_space<vmem>>, vector<128x128xbf16>
    %cst_8 = arith.constant dense<0.000000e+00> : vector<128x128xf32>
    %10 = tpu.matmul %8, %9, %cst_8 {dimension_numbers = #tpu.dot_dimension_numbers<[1], [0], [0], [1], [0, 0, 1, 1], [], []>} : vector<128x128xbf16>, vector<128x128xbf16>, vector<128x128xf32> -> vector<128x128xf32>
    %c0_9 = arith.constant 0 : index
    %c0_10 = arith.constant 0 : index
    %11 = vector.load %arg5[%c0_9, %c0_10] : memref<1x128xf32, #tpu.memory_space<vmem>>, vector<1x128xf32>
    %12 = vector.broadcast %11 : vector<1x128xf32> to vector<128x128xf32>
    %13 = arith.addf %10, %12 : vector<128x128xf32>
    %cst_11 = arith.constant 0.000000e+00 : f32
    %14 = vector.broadcast %cst_11 : f32 to vector<128x128xf32>
    %15 = arith.maximumf %13, %14 : vector<128x128xf32>
    %16 = vector.shape_cast %15 : vector<128x128xf32> to vector<1x128x128xf32>
    %c0_12 = arith.constant 0 : index
    %c0_13 = arith.constant 0 : index
    %17 = vector.load %arg6[%c0_12, %c0_13] : memref<1x128xf32, #tpu.memory_space<vmem>>, vector<1x128xf32>
    %18 = vector.shape_cast %17 : vector<1x128xf32> to vector<1x1x128xf32>
    %19 = vector.broadcast %18 : vector<1x1x128xf32> to vector<1x128x128xf32>
    %20 = arith.mulf %16, %19 : vector<1x128x128xf32>
    %cst_14 = arith.constant dense<0.000000e+00> : vector<1x128xf32>
    %21 = vector.multi_reduction <add>, %20, %cst_14 [2] : vector<1x128x128xf32> to vector<1x128xf32>
    %22 = vector.shape_cast %21 : vector<1x128xf32> to vector<1x128x1xf32>
    %23 = tpu.iota {dimensions = array<i32: 0>} : vector<128x128xi32>
    %24 = tpu.iota {dimensions = array<i32: 1>} : vector<128x128xi32>
    %25 = arith.cmpi eq, %23, %24 : vector<128x128xi32>
    %cst_15 = arith.constant 0.000000e+00 : f32
    %26 = vector.shape_cast %25 : vector<128x128xi1> to vector<1x128x128xi1>
    %27 = vector.shape_cast %22 : vector<1x128x1xf32> to vector<1x128x1xf32>
    %28 = vector.broadcast %27 : vector<1x128x1xf32> to vector<1x128x128xf32>
    %29 = vector.broadcast %cst_15 : f32 to vector<1x128x128xf32>
    %30 = arith.select %26, %28, %29 : vector<1x128x128xi1>, vector<1x128x128xf32>
    %cst_16 = arith.constant dense<0.000000e+00> : vector<1x128xf32>
    %31 = vector.multi_reduction <add>, %30, %cst_16 [1] : vector<1x128x128xf32> to vector<1x128xf32>
    %c0_17 = arith.constant 0 : index
    %c0_18 = arith.constant 0 : index
    %32 = vector.load %arg7[%c0_17, %c0_18] : memref<1x1xf32, #tpu.memory_space<vmem>>, vector<1x1xf32>
    %33 = vector.broadcast %32 : vector<1x1xf32> to vector<1x128xf32>
    %34 = arith.addf %31, %33 : vector<1x128xf32>
    %c0_19 = arith.constant 0 : index
    %c0_20 = arith.constant 0 : index
    %35 = vector.load %arg8[%c0_19, %c0_20] : memref<1x128xf32, #tpu.memory_space<vmem>>, vector<1x128xf32>
    tpu.vector_store %arg8[%c0_19, %c0_20], %34 {strides = array<i32>} : memref<1x128xf32, #tpu.memory_space<vmem>>, vector<1x128xf32>,
    return
  }
  func.func @transform_0(%arg0: i32) -> (i32, i32) {
    %c0_i32 = arith.constant 0 : i32
    %c0_i32_0 = arith.constant 0 : i32
    return %arg0, %c0_i32 : i32, i32
  }
  func.func @transform_1(%arg0: i32) -> (i32, i32) {
    %c0_i32 = arith.constant 0 : i32
    %c0_i32_0 = arith.constant 0 : i32
    %c0_i32_1 = arith.constant 0 : i32
    return %c0_i32, %c0_i32_0 : i32, i32
  }
  func.func @transform_2(%arg0: i32) -> (i32, i32) {
    %c0_i32 = arith.constant 0 : i32
    %c0_i32_0 = arith.constant 0 : i32
    %c0_i32_1 = arith.constant 0 : i32
    return %c0_i32, %c0_i32_0 : i32, i32
  }
  func.func @transform_3(%arg0: i32) -> (i32, i32) {
    %c0_i32 = arith.constant 0 : i32
    %c0_i32_0 = arith.constant 0 : i32
    %c0_i32_1 = arith.constant 0 : i32
    return %c0_i32, %c0_i32_0 : i32, i32
  }
  func.func @transform_4(%arg0: i32) -> (i32, i32) {
    %c0_i32 = arith.constant 0 : i32
    %c0_i32_0 = arith.constant 0 : i32
    %c0_i32_1 = arith.constant 0 : i32
    return %c0_i32, %c0_i32_0 : i32, i32
  }
  func.func @transform_5(%arg0: i32) -> (i32, i32) {
    %c0_i32 = arith.constant 0 : i32
    %c0_i32_0 = arith.constant 0 : i32
    %c0_i32_1 = arith.constant 0 : i32
    return %c0_i32, %c0_i32_0 : i32, i32
  }
  func.func @transform_6(%arg0: i32) -> (i32, i32) {
    %c0_i32 = arith.constant 0 : i32
    %c0_i32_0 = arith.constant 0 : i32
    %c0_i32_1 = arith.constant 0 : i32
    return %c0_i32, %c0_i32_0 : i32, i32
  }
  func.func @transform_7(%arg0: i32) -> (i32, i32) {
    %c0_i32 = arith.constant 0 : i32
    %c0_i32_0 = arith.constant 0 : i32
    return %arg0, %c0_i32 : i32, i32
  }
}

</mosaic_0001>

<bundles_post_ra>
// kernel: tpu_custom_call.1
= control target key start
LH: loop header
LB: loop body
LE: loop exit
PB: predicated region body
PF: predicated region fallthrough
CT: control target
= control target key end

     0   :  { %s798_s0 = inlined_call_operand.vmem [shape: f32[128,10], index: 0, kind: input, shape index: {}]   ;;  %s799_s1 = inlined_call_operand.vmem [shape: f32[10,128], index: 1, kind: input, shape index: {}]   ;;  %s800_s2 = inlined_call_operand.vmem [shape: f32[1,128], index: 2, kind: input, shape index: {}]   ;;  %s801_s3 = inlined_call_operand.vmem [shape: bf16[128,128], index: 3, kind: input, shape index: {}]   ;;  %s802_s4 = inlined_call_operand.vmem [shape: f32[1,128], index: 4, kind: input, shape index: {}]   ;;  %s803_s5 = inlined_call_operand.vmem [shape: f32[1,128], index: 5, kind: input, shape index: {}]   ;;  %s804_s6 = inlined_call_operand.<no memory space> [shape: f32[1,1], index: 6, kind: input, shape index: {}]   ;;  %s805_s7 = inlined_call_operand.hbm [shape: f32[1,128], index: 7, kind: output, shape index: {}]  }
   0x1   :  { %v12_v0 = vstv %s804_s6 }
   0x2   :  { %13 = vst [vmem:[#allocation2] sm:$0x1] %v12_v0 }
   0x3   :  { %v46_v1 = vld [vmem:[%s799_s1 + $0x8] sm:$0x3]  ;;  %vm100_vm0 = vcmask 1041408   ;;  %v45_v2 = vld [vmem:[%s799_s1] sm:$0xff]  ;;  %vm51_vm1 = vcmask 80896  }
   0x4   :  { %475 = vmatpush.msk.msra.mxu0 %vm100_vm0, %v46_v1  ;;  %v29_v3 = vld [vmem:[%s798_s0] sm:$0xff]  ;;  %532 = vmatpush.msk.msra.mxu3 %vm100_vm0, %v46_v1 }
   0x6   :  { %119 = vmatpush.msra.mxu0 %v45_v2  ;;  %533 = vmatpush.msra.mxu3 %v45_v2 }
   0x7   :  { %14 = vsyncpa [#allocation4], 0  ;;  %476 = vmatmul.msk.f32.vlgmr.msra.gmra.mxu0 %vm51_vm1, %v29_v3  ;;  %v30_v4 = vld [vmem:[%s798_s0 + $0x8] sm:$0xff]  ;;  %v31_v5 = vld [vmem:[%s798_s0 + $0x10] sm:$0xff]  ;;  %s466_s9 = sshll.u32 %s805_s7, 4  ;;  %s467_s9 = int_to_ptr.hbm [resolvable:$true] %s466_s9 }
   0x8   :  { %v32_v6 = vld [vmem:[%s798_s0 + $0x18] sm:$0xff]  ;;  %v33_v7 = vld [vmem:[%s798_s0 + $0x20] sm:$0xff]  ;;  %v39_v8 = vld [vmem:[%s798_s0 + $0x50] sm:$0xff] }
   0x9   :  { %486 = vmatmul.msk.f32.vlgmr.msra.gmra.mxu3 %vm51_vm1, %v39_v8  ;;  %v34_v9 = vld [vmem:[%s798_s0 + $0x28] sm:$0xff]  ;;  %v40_v10 = vld [vmem:[%s798_s0 + $0x58] sm:$0xff]  ;;  %v530_v12 = vld [vmem:[%s801_s3 + $0x30] sm:$0xff] }
   0xa   :  { %v531_v11 = vld [vmem:[%s801_s3 + $0x38] sm:$0xff]  ;;  %v35_v13 = vld [vmem:[%s798_s0 + $0x30] sm:$0xff]  ;;  %v41_v14 = vld [vmem:[%s798_s0 + $0x60] sm:$0xff] }
   0xb   :  { %261 = vmatpush.bf16.msra.mxu1 %v531_v11  ;;  %534 = vmatpush.bf16.msra.mxu2 %v531_v11  ;;  %v529_v15 = vld [vmem:[%s801_s3 + $0x28] sm:$0xff]  ;;  %v528_v16 = vld [vmem:[%s801_s3 + $0x20] sm:$0xff]  ;;  %v36_v17 = vld [vmem:[%s798_s0 + $0x38] sm:$0xff] }
   0xc   :  { %v42_v18 = vld [vmem:[%s798_s0 + $0x68] sm:$0xff]  ;;  %v37_v19 = vld [vmem:[%s798_s0 + $0x40] sm:$0xff]  ;;  %v43_v20 = vld [vmem:[%s798_s0 + $0x70] sm:$0xff] }
   0xd   :  { %v38_v21 = vld [vmem:[%s798_s0 + $0x48] sm:$0xff]  ;;  %v44_v22 = vld [vmem:[%s798_s0 + $0x78] sm:$0xff]  ;;  %v526_v24 = vld [vmem:[%s801_s3 + $0x10] sm:$0xff] }
   0xe   :  { %v527_v23 = vld [vmem:[%s801_s3 + $0x18] sm:$0xff]  ;;  %v525_v25 = vld [vmem:[%s801_s3 + $0x8] sm:$0xff]  ;;  %v524_v26 = vld [vmem:[%s801_s3] sm:$0xff] }
   0xf   :  { %477 = vmatmul.msk.f32.gmra.mxu0 %vm51_vm1, %v30_v4  ;;  %262 = vmatpush.bf16.msra.mxu1 %v530_v12  ;;  %v546_v28 = vld [vmem:[%s800_s2] ss:$0 sm:$0xff] }
  0x10   :  { %535 = vmatpush.bf16.msra.mxu2 %v530_v12 }
  0x11   :  { %487 = vmatmul.msk.f32.gmra.mxu3 %vm51_vm1, %v40_v10 }
  0x13   :  { %263 = vmatpush.bf16.msra.mxu1 %v529_v15 }
  0x14   :  { %536 = vmatpush.bf16.msra.mxu2 %v529_v15 }
  0x17   :  { %478 = vmatmul.msk.f32.gmra.mxu0 %vm51_vm1, %v31_v5  ;;  %264 = vmatpush.bf16.msra.mxu1 %v528_v16 }
  0x18   :  { %537 = vmatpush.bf16.msra.mxu2 %v528_v16 }
  0x19   :  { %488 = vmatmul.msk.f32.gmra.mxu3 %vm51_vm1, %v41_v14 }
  0x1b   :  { %265 = vmatpush.bf16.msra.mxu1 %v527_v23 }
  0x1c   :  { %538 = vmatpush.bf16.msra.mxu2 %v527_v23  ;;  %v726_v23 = vld [vmem:[%s803_s5] ss:$0 sm:$0xff] }
  0x1f   :  { %479 = vmatmul.msk.f32.gmra.mxu0 %vm51_vm1, %v32_v6  ;;  %266 = vmatpush.bf16.msra.mxu1 %v526_v24 }
  0x20   :  { %539 = vmatpush.bf16.msra.mxu2 %v526_v24 }
  0x21   :  { %489 = vmatmul.msk.f32.gmra.mxu3 %vm51_vm1, %v42_v18 }
  0x23   :  { %267 = vmatpush.bf16.msra.mxu1 %v525_v25 }
  0x24   :  { %540 = vmatpush.bf16.msra.mxu2 %v525_v25 }
  0x27   :  { %480 = vmatmul.msk.f32.gmra.mxu0 %vm51_vm1, %v33_v7  ;;  %268 = vmatpush.bf16.msra.mxu1 %v524_v26 }
  0x28   :  { %541 = vmatpush.bf16.msra.mxu2 %v524_v26 }
  0x29   :  { %490 = vmatmul.msk.f32.gmra.mxu3 %vm51_vm1, %v43_v20  ;;  %v720_v20 = vld [vmem:[%s802_s4] ss:$0 sm:$0xff]  ;;  %s576_s4 = smov [#allocation3]  }
  0x2a   :  { %s464_s5 = sshll.u32 %s576_s4, 4  ;;  %s465_s5 = int_to_ptr.vmem [resolvable:$true] %s464_s5 }
  0x2f   :  { %481 = vmatmul.msk.f32.gmra.mxu0 %vm51_vm1, %v34_v9 }
  0x31   :  { %491 = vmatmul.msk.f32.gmra.mxu3 %vm51_vm1, %v44_v22 }
  0x37   :  { %482 = vmatmul.msk.f32.gmra.mxu0 %vm51_vm1, %v35_v13 }
  0x3f   :  { %483 = vmatmul.msk.f32.gmra.mxu0 %vm51_vm1, %v36_v17 }
  0x47   :  { %484 = vmatmul.msk.f32.gmra.mxu0 %vm51_vm1, %v37_v19 }
  0x4f   :  { %485 = vmatmul.msk.f32.gmra.mxu0 %vm51_vm1, %v38_v21 }
  0x84   :  { %v121_v27 = vpop.f32.mrf.mxu0 }
  0x85   :  { %v122_v29 = vadd.f32 %v546_v28, %v121_v27 }
  0x87   :  { %v169_v32 = vmax.f32 %v122_v29, 0.0 }
  0x8c   :  { %v124_v30 = vpop.f32.mrf.mxu0  ;;  %v151_v57 = vpop.f32.mrf.mxu3 }
  0x8d   :  { %v125_v31 = vadd.f32 %v546_v28, %v124_v30  ;;  %v152_v2 = vadd.f32 %v546_v28, %v151_v57 }
  0x8f   :  { %v170_v33 = vmax.f32 %v125_v31, 0.0  ;;  %v179_v4 = vmax.f32 %v152_v2, 0.0 }
  0x91   :  { %v185_v34 = vpack.c.bf16 %v170_v33, %v169_v32 }
  0x93   :  { %269 = vmatmul.bf16.vlgmr.msra.gmra.mxu1 %v185_v34 }
  0x94   :  { %v127_v35 = vpop.f32.mrf.mxu0  ;;  %v154_v61 = vpop.f32.mrf.mxu3 }
  0x95   :  { %v128_v36 = vadd.f32 %v546_v28, %v127_v35  ;;  %v155_v3 = vadd.f32 %v546_v28, %v154_v61 }
  0x97   :  { %v171_v39 = vmax.f32 %v128_v36, 0.0  ;;  %v180_v5 = vmax.f32 %v155_v3, 0.0 }
  0x99   :  { %v190_v6 = vpack.c.bf16 %v180_v5, %v179_v4 }
  0x9c   :  { %v130_v37 = vpop.f32.mrf.mxu0  ;;  %v157_v1 = vpop.f32.mrf.mxu3 }
  0x9d   :  { %v131_v38 = vadd.f32 %v546_v28, %v130_v37  ;;  %v158_v8 = vadd.f32 %v546_v28, %v157_v1 }
  0x9f   :  { %v172_v40 = vmax.f32 %v131_v38, 0.0  ;;  %v181_v11 = vmax.f32 %v158_v8, 0.0 }
  0xa1   :  { %v186_v41 = vpack.c.bf16 %v172_v40, %v171_v39 }
  0xa3   :  { %274 = vmatmul.bf16.gmra.mxu1 %v186_v41 }
  0xa4   :  { %v133_v42 = vpop.f32.mrf.mxu0  ;;  %v160_v7 = vpop.f32.mrf.mxu3 }
  0xa5   :  { %v134_v43 = vadd.f32 %v546_v28, %v133_v42  ;;  %v161_v9 = vadd.f32 %v546_v28, %v160_v7 }
  0xa7   :  { %v173_v46 = vmax.f32 %v134_v43, 0.0  ;;  %v182_v12 = vmax.f32 %v161_v9, 0.0 }
  0xa9   :  { %v191_v13 = vpack.c.bf16 %v182_v12, %v181_v11 }
  0xac   :  { %v136_v44 = vpop.f32.mrf.mxu0  ;;  %v163_v10 = vpop.f32.mrf.mxu3 }
  0xad   :  { %v137_v45 = vadd.f32 %v546_v28, %v136_v44  ;;  %v164_v15 = vadd.f32 %v546_v28, %v163_v10  ;;  %v575_v10 = vmov 0  }
  0xae   :  { %544 = vset.pattern.permute.xlu1 %v575_v10  ;;  %545 = vset.pattern.permute.xlu0 %v575_v10 }
  0xaf   :  { %v174_v47 = vmax.f32 %v137_v45, 0.0  ;;  %v183_v17 = vmax.f32 %v164_v15, 0.0 }
  0xb1   :  { %v187_v48 = vpack.c.bf16 %v174_v47, %v173_v46 }
  0xb3   :  { %279 = vmatmul.bf16.gmra.mxu1 %v187_v48 }
  0xb4   :  { %v139_v49 = vpop.f32.mrf.mxu0  ;;  %v166_v14 = vpop.f32.mrf.mxu3 }
  0xb5   :  { %v140_v50 = vadd.f32 %v546_v28, %v139_v49  ;;  %v167_v16 = vadd.f32 %v546_v28, %v166_v14 }
  0xb7   :  { %v175_v53 = vmax.f32 %v140_v50, 0.0  ;;  %v184_v18 = vmax.f32 %v167_v16, 0.0 }
  0xb9   :  { %v192_v19 = vpack.c.bf16 %v184_v18, %v183_v17 }
  0xbc   :  { %v142_v51 = vpop.f32.mrf.mxu0 }
  0xbd   :  { %v143_v52 = vadd.f32 %v546_v28, %v142_v51 }
  0xbf   :  { %v176_v54 = vmax.f32 %v143_v52, 0.0 }
  0xc1   :  { %v188_v55 = vpack.c.bf16 %v176_v54, %v175_v53 }
  0xc3   :  { %284 = vmatmul.bf16.gmra.mxu1 %v188_v55 }
  0xc4   :  { %v145_v56 = vpop.f32.mrf.mxu0 }
  0xc5   :  { %v146_v58 = vadd.f32 %v546_v28, %v145_v56 }
  0xc7   :  { %v177_v62 = vmax.f32 %v146_v58, 0.0 }
  0xcc   :  { %v148_v59 = vpop.f32.mrf.mxu0 }
  0xcd   :  { %v149_v60 = vadd.f32 %v546_v28, %v148_v59 }
  0xcf   :  { %v178_v63 = vmax.f32 %v149_v60, 0.0 }
  0xd1   :  { %v189_v0 = vpack.c.bf16 %v178_v63, %v177_v62 }
  0xd3   :  { %289 = vmatmul.bf16.vlgmr.msra.gmra.mxu2 %v189_v0 }
  0xe3   :  { %294 = vmatmul.bf16.gmra.mxu2 %v190_v6 }
  0xf3   :  { %299 = vmatmul.bf16.gmra.mxu2 %v191_v13 }
 0x103   :  { %304 = vmatmul.bf16.gmra.mxu2 %v192_v19 }
 0x110   :  { %v270_v21 = vpop.f32.mrf.mxu1 }
 0x111   :  { %v271_v22 = vadd.f32 %v720_v20, %v270_v21 }
 0x113   :  { %v310_v24 = vmax.f32 %v271_v22, 0.0 }
 0x115   :  { %v330_v25 = vmul.f32 %v726_v23, %v310_v24 }
 0x117   :  { %346 = vadd.xlane.f32.xlu0 %v330_v25  ;;  %v450_v25 = vld [vmem:[#allocation2] sm:$0x1] }
 0x118   :  { %v272_v26 = vpop.f32.mrf.mxu1 }
 0x119   :  { %v273_v27 = vadd.f32 %v720_v20, %v272_v26 }
 0x11b   :  { %v311_v28 = vmax.f32 %v273_v27, 0.0  ;;  %v378_v27 = vlaneseq }
 0x11d   :  { %v331_v29 = vmul.f32 %v726_v23, %v311_v28 }
 0x11f   :  { %348 = vadd.xlane.f32.xlu0 %v331_v29 }
 0x120   :  { %v275_v30 = vpop.f32.mrf.mxu1 }
 0x121   :  { %v276_v31 = vadd.f32 %v720_v20, %v275_v30  ;;  %v759_v30 = vshrl.u32 %v378_v27, 7 }
 0x123   :  { %v312_v32 = vmax.f32 %v276_v31, 0.0  ;;  %v380_v31 = vadd.s32 8, %v759_v30 }
 0x125   :  { %v332_v33 = vmul.f32 %v726_v23, %v312_v32  ;;  %v762_v32 = vand.u32 127, %v378_v27 }
 0x127   :  { %350 = vadd.xlane.f32.xlu1 %v332_v33  ;;  %vm398_vm2 = vcmp.eq.s32.totalorder %v380_v31, %v762_v32  ;;  %vm397_vm3 = vcmp.eq.s32.totalorder %v759_v30, %v762_v32 }
 0x128   :  { %v277_v34 = vpop.f32.mrf.mxu1 }
 0x129   :  { %v278_v35 = vadd.f32 %v720_v20, %v277_v34  ;;  %v381_v34 = vadd.s32 16, %v759_v30 }
 0x12b   :  { %v313_v36 = vmax.f32 %v278_v35, 0.0  ;;  %vm399_vm4 = vcmp.eq.s32.totalorder %v381_v34, %v762_v32  ;;  %v383_v35 = vadd.s32 32, %v759_v30 }
 0x12d   :  { %v333_v37 = vmul.f32 %v726_v23, %v313_v36  ;;  %vm401_vm6 = vcmp.eq.s32.totalorder %v383_v35, %v762_v32 }
 0x12f   :  { %352 = vadd.xlane.f32.xlu1 %v333_v37 }
 0x130   :  { %v280_v38 = vpop.f32.mrf.mxu1 }
 0x131   :  { %v281_v39 = vadd.f32 %v720_v20, %v280_v38  ;;  %v384_v38 = vadd.s32 40, %v759_v30 }
 0x133   :  { %v314_v40 = vmax.f32 %v281_v39, 0.0  ;;  %vm402_vm7 = vcmp.eq.s32.totalorder %v384_v38, %v762_v32 }
 0x135   :  { %v334_v41 = vmul.f32 %v726_v23, %v314_v40 }
 0x137   :  { %354 = vadd.xlane.f32.xlu2 %v334_v41 }
 0x138   :  { %v282_v42 = vpop.f32.mrf.mxu1 }
 0x139   :  { %v283_v43 = vadd.f32 %v720_v20, %v282_v42  ;;  %v385_v42 = vadd.s32 48, %v759_v30 }
 0x13b   :  { %v315_v44 = vmax.f32 %v283_v43, 0.0  ;;  %vm403_vm8 = vcmp.eq.s32.totalorder %v385_v42, %v762_v32 }
 0x13d   :  { %v335_v45 = vmul.f32 %v726_v23, %v315_v44 }
 0x13f   :  { %356 = vadd.xlane.f32.xlu2 %v335_v45 }
 0x140   :  { %v285_v46 = vpop.f32.mrf.mxu1 }
 0x141   :  { %v286_v47 = vadd.f32 %v720_v20, %v285_v46  ;;  %v386_v46 = vadd.s32 56, %v759_v30 }
 0x143   :  { %v316_v48 = vmax.f32 %v286_v47, 0.0  ;;  %vm404_vm9 = vcmp.eq.s32.totalorder %v386_v46, %v762_v32 }
 0x145   :  { %v336_v49 = vmul.f32 %v726_v23, %v316_v48 }
 0x147   :  { %358 = vadd.xlane.f32.xlu0 %v336_v49 }
 0x148   :  { %v287_v50 = vpop.f32.mrf.mxu1 }
 0x149   :  { %v288_v51 = vadd.f32 %v720_v20, %v287_v50  ;;  %v387_v50 = vadd.s32 64, %v759_v30 }
 0x14b   :  { %v317_v52 = vmax.f32 %v288_v51, 0.0  ;;  %vm405_vm10 = vcmp.eq.s32.totalorder %v387_v50, %v762_v32 }
 0x14d   :  { %v337_v53 = vmul.f32 %v726_v23, %v317_v52 }
 0x14f   :  { %360 = vadd.xlane.f32.xlu1 %v337_v53 }
 0x156   :  { %v290_v54 = vpop.f32.mrf.mxu2 }
 0x157   :  { %v291_v55 = vadd.f32 %v720_v20, %v290_v54  ;;  %v388_v54 = vadd.s32 72, %v759_v30 }
 0x159   :  { %v318_v56 = vmax.f32 %v291_v55, 0.0  ;;  %vm406_vm11 = vcmp.eq.s32.totalorder %v388_v54, %v762_v32 }
 0x15b   :  { %v338_v57 = vmul.f32 %v726_v23, %v318_v56 }
 0x15d   :  { %362 = vadd.xlane.f32.xlu2 %v338_v57 }
 0x15e   :  { %v292_v58 = vpop.f32.mrf.mxu2 }
 0x15f   :  { %v293_v59 = vadd.f32 %v720_v20, %v292_v58  ;;  %v389_v58 = vadd.s32 80, %v759_v30 }
 0x161   :  { %v319_v60 = vmax.f32 %v293_v59, 0.0  ;;  %vm407_vm12 = vcmp.eq.s32.totalorder %v389_v58, %v762_v32 }
 0x163   :  { %v339_v61 = vmul.f32 %v726_v23, %v319_v60 }
 0x165   :  { %364 = vadd.xlane.f32.xlu0 %v339_v61 }
 0x166   :  { %v295_v62 = vpop.f32.mrf.mxu2 }
 0x167   :  { %v296_v63 = vadd.f32 %v720_v20, %v295_v62  ;;  %v390_v62 = vadd.s32 88, %v759_v30 }
 0x169   :  { %v320_v0 = vmax.f32 %v296_v63, 0.0  ;;  %vm408_vm13 = vcmp.eq.s32.totalorder %v390_v62, %v762_v32 }
 0x16b   :  { %v340_v1 = vmul.f32 %v726_v23, %v320_v0 }
 0x16d   :  { %366 = vadd.xlane.f32.xlu1 %v340_v1 }
 0x16e   :  { %v297_v2 = vpop.f32.mrf.mxu2 }
 0x16f   :  { %v298_v3 = vadd.f32 %v720_v20, %v297_v2  ;;  %v391_v2 = vadd.s32 96, %v759_v30 }
 0x171   :  { %v321_v4 = vmax.f32 %v298_v3, 0.0  ;;  %vm409_vm14 = vcmp.eq.s32.totalorder %v391_v2, %v762_v32 }
 0x173   :  { %v341_v5 = vmul.f32 %v726_v23, %v321_v4 }
 0x175   :  { %368 = vadd.xlane.f32.xlu2 %v341_v5  ;;  %v392_v5 = vadd.s32 104, %v759_v30 }
 0x176   :  { %v300_v6 = vpop.f32.mrf.mxu2 }
 0x177   :  { %v301_v7 = vadd.f32 %v720_v20, %v300_v6  ;;  %vm410_vm15 = vcmp.eq.s32.totalorder %v392_v5, %v762_v32 }
 0x179   :  { %v322_v8 = vmax.f32 %v301_v7, 0.0 }
 0x17b   :  { %v342_v9 = vmul.f32 %v726_v23, %v322_v8 }
 0x17d   :  { %370 = vadd.xlane.f32.xlu0 %v342_v9  ;;  %v393_v9 = vadd.s32 112, %v759_v30 }
 0x17e   :  { %v302_v11 = vpop.f32.mrf.mxu2 }
 0x17f   :  { %v303_v12 = vadd.f32 %v720_v20, %v302_v11  ;;  %vm411_vm0 = vcmp.eq.s32.totalorder %v393_v9, %v762_v32 }
 0x181   :  { %v323_v13 = vmax.f32 %v303_v12, 0.0 }
 0x183   :  { %v343_v14 = vmul.f32 %v726_v23, %v323_v13 }
 0x185   :  { %372 = vadd.xlane.f32.xlu1 %v343_v14 }
 0x186   :  { %v305_v15 = vpop.f32.mrf.mxu2 }
 0x187   :  { %v306_v16 = vadd.f32 %v720_v20, %v305_v15 }
 0x189   :  { %v324_v17 = vmax.f32 %v306_v16, 0.0  ;;  %v394_v16 = vadd.s32 120, %v759_v30 }
 0x18a   :  { %v347_v26 = vpop.xlane.xlu0 %346 }
 0x18b   :  { %v344_v18 = vmul.f32 %v726_v23, %v324_v17  ;;  %v413_v39 = vsel %vm397_vm3, %v347_v26, 0.0  ;;  %vm412_vm1 = vcmp.eq.s32.totalorder %v394_v16, %v762_v32 }
 0x18d   :  { %374 = vadd.xlane.f32.xlu2 %v344_v18 }
 0x18e   :  { %v307_v19 = vpop.f32.mrf.mxu2 }
 0x18f   :  { %v308_v21 = vadd.f32 %v720_v20, %v307_v19  ;;  %v382_v20 = vadd.s32 24, %v759_v30 }
 0x191   :  { %v325_v22 = vmax.f32 %v308_v21, 0.0  ;;  %vm400_vm5 = vcmp.eq.s32.totalorder %v382_v20, %v762_v32 }
 0x192   :  { %v349_v33 = vpop.xlane.xlu0 %348 }
 0x193   :  { %v345_v24 = vmul.f32 %v726_v23, %v325_v22  ;;  %v414_v37 = vsel %vm398_vm2, %v349_v33, 0.0 }
 0x194   :  { %v429_v41 = vadd.f32 %v414_v37, %v413_v39 }
 0x195   :  { %376 = vadd.xlane.f32.xlu0 %v345_v24 }
 0x19a   :  { %v351_v28 = vpop.xlane.xlu1 %350 }
 0x19b   :  { %v415_v40 = vsel %vm399_vm4, %v351_v28, 0.0 }
 0x19c   :  { %v430_v45 = vadd.f32 %v429_v41, %v415_v40 }
 0x19e   :  { %453 = vperm.xlu1 %544, %v450_v25  }
 0x1a2   :  { %v353_v23 = vpop.xlane.xlu1 %352 }
 0x1a3   :  { %v416_v44 = vsel %vm400_vm5, %v353_v23, 0.0 }
 0x1a4   :  { %v431_v49 = vadd.f32 %v430_v45, %v416_v44 }
 0x1aa   :  { %v355_v29 = vpop.xlane.xlu2 %354 }
 0x1ab   :  { %v417_v48 = vsel %vm401_vm6, %v355_v29, 0.0 }
 0x1ac   :  { %v432_v53 = vadd.f32 %v431_v49, %v417_v48 }
 0x1b2   :  { %v357_v36 = vpop.xlane.xlu2 %356 }
 0x1b3   :  { %v418_v52 = vsel %vm402_vm7, %v357_v36, 0.0 }
 0x1b4   :  { %v433_v56 = vadd.f32 %v432_v53, %v418_v52 }
 0x1ba   :  { %v359_v43 = vpop.xlane.xlu0 %358 }
 0x1bb   :  { %v419_v55 = vsel %vm403_vm8, %v359_v43, 0.0 }
 0x1bc   :  { %v434_v60 = vadd.f32 %v433_v56, %v419_v55 }
 0x1c2   :  { %v361_v47 = vpop.xlane.xlu1 %360 }
 0x1c3   :  { %v420_v59 = vsel %vm404_vm9, %v361_v47, 0.0 }
 0x1c4   :  { %v435_v0 = vadd.f32 %v434_v60, %v420_v59 }
 0x1d0   :  { %v363_v51 = vpop.xlane.xlu2 %362 }
 0x1d1   :  { %v421_v63 = vsel %vm405_vm10, %v363_v51, 0.0 }
 0x1d2   :  { %v436_v4 = vadd.f32 %v435_v0, %v421_v63 }
 0x1d8   :  { %v365_v57 = vpop.xlane.xlu0 %364 }
 0x1d9   :  { %v422_v3 = vsel %vm406_vm11, %v365_v57, 0.0 }
 0x1da   :  { %v437_v7 = vadd.f32 %v436_v4, %v422_v3 }
 0x1e0   :  { %v367_v61 = vpop.xlane.xlu1 %366 }
 0x1e1   :  { %v423_v6 = vsel %vm407_vm12, %v367_v61, 0.0 }
 0x1e2   :  { %v438_v11 = vadd.f32 %v437_v7, %v423_v6 }
 0x1e8   :  { %v369_v1 = vpop.xlane.xlu2 %368 }
 0x1e9   :  { %v424_v10 = vsel %vm408_vm13, %v369_v1, 0.0 }
 0x1ea   :  { %v439_v14 = vadd.f32 %v438_v11, %v424_v10 }
 0x1f0   :  { %v371_v8 = vpop.xlane.xlu0 %370 }
 0x1f1   :  { %v425_v13 = vsel %vm409_vm14, %v371_v8, 0.0 }
 0x1f2   :  { %v440_v18 = vadd.f32 %v439_v14, %v425_v13 }
 0x1f8   :  { %v373_v12 = vpop.xlane.xlu1 %372 }
 0x1f9   :  { %v426_v17 = vsel %vm410_vm15, %v373_v12, 0.0 }
 0x1fa   :  { %v441_v21 = vadd.f32 %v440_v18, %v426_v17 }
 0x200   :  { %v375_v15 = vpop.xlane.xlu2 %374 }
 0x201   :  { %v427_v19 = vsel %vm411_vm0, %v375_v15, 0.0 }
 0x202   :  { %v442_v22 = vadd.f32 %v441_v21, %v427_v19 }
 0x208   :  { %v377_v24 = vpop.xlane.xlu0 %376 }
 0x209   :  { %v428_v25 = vsel %vm412_vm1, %v377_v24, 0.0 }
 0x20a   :  { %v443_v26 = vadd.f32 %v442_v22, %v428_v25 }
 0x20c   :  { %v444_v27 = vrot.slane %v443_v26, 4 }
 0x20e   :  { %v445_v28 = vadd.f32 %v444_v27, %v443_v26 }
 0x210   :  { %v446_v29 = vrot.slane %v445_v28, 2  ;;  %v454_v31 = vpop.permute.xlu1 %453 }
 0x211   :  { %v456_v20 = vperm.slane %v454_v31, 0 }
 0x212   :  { %v447_v33 = vadd.f32 %v446_v29, %v445_v28 }
 0x214   :  { %v448_v34 = vrot.slane %v447_v33, 1 }
 0x216   :  { %v449_v30 = vadd.f32 %v448_v34, %v447_v33 }
 0x218   :  { %v457_v23 = vadd.f32 %v456_v20, %v449_v30 }
 0x21a   :  { %458 = vst [vmem:[#allocation3] sm:$0x1] %v457_v23 }
 0x21b   :  { %469 = dma.vmem_to_hbm [thread:$0]  %s465_s5, 16, %s467_s9, [#allocation4]  }
 0x21c   :  { %573 = dma.done.wait [#allocation4], 16  }
 0x21d   :  { %574 = vsyncadd [#allocation4], 4294967280 }
 0x21e   :  { %474 = vsyncpa [#allocation4], 1 }

</bundles_post_ra>
